<compile_context>
chip_gen: v7x
topology: tpu7x:2x2x1
jax: 0.10.0
libtpu: 0.0.40
codegen_flags: <defaults>
</compile_context>

<pallas_src>
import functools
import math

import jax
import jax.numpy as jnp
from jax.experimental import pallas as pl
from jax.experimental.pallas import tpu as pltpu


# -----------------------------------------------------------------------------
# Pallas kernel: whole 5-layer MLP fused, grid over batch tiles.
# Weights arrive pre-folded (BN scale into W, BN shift into bias) and in bf16.
# -----------------------------------------------------------------------------
def _mlp_kernel(x_ref,
                w1, b1, w2, b2, w3, b3, w4, b4,
                w5, b5,
                o_ref):
    def hidden(h, w_ref, b_ref):
        y = jnp.dot(h, w_ref[...], preferred_element_type=jnp.float32)
        y = y + b_ref[...]                    # folded bias + BN shift, (1,H) bcast
        y = jnp.maximum(y, 0.2 * y)           # LeakyReLU(0.2): mul+max, no select
        return y.astype(jnp.bfloat16)         # bf16 feed for the next MXU pass

    h = x_ref[...]                            # (block_b, D_in_pad) bf16
    h = hidden(h, w1, b1)                     # dropout1/2/3 are identity in eval
    h = hidden(h, w2, b2)
    h = hidden(h, w3, b3)
    h = hidden(h, w4, b4)
    out = jnp.dot(h, w5[...], preferred_element_type=jnp.float32) + b5[...]
    o_ref[...] = out.astype(o_ref.dtype)      # lane-dense (block_b, 256) store


# -----------------------------------------------------------------------------
# Helpers
# -----------------------------------------------------------------------------
def _round_up(n, m):
    return ((n + m - 1) // m) * m


def _buffered_supported():
    """Can we request single-buffering for grid-invariant params?"""
    if not hasattr(pl, "Buffered"):
        return False
    try:
        pl.BlockSpec((8, 128), lambda i: (0, 0), pipeline_mode=pl.Buffered(1))
        return True
    except TypeError:
        return False


_SINGLE_BUFFER_PARAMS = _buffered_supported()


def _vmem_capacity_bytes():
    try:
        return int(pltpu.get_tpu_info().vmem_capacity_bytes)
    except Exception:
        return 64 << 20           # conservative: v7x per-TensorCore VMEM


_VMEM_CAP = _vmem_capacity_bytes()


def _resident_spec(shape):
    """Grid-invariant parameter kept resident in VMEM; single-buffered if supported."""
    ndim = len(shape)
    idx = lambda i, _n=ndim: (0,) * _n
    if _SINGLE_BUFFER_PARAMS:
        return pl.BlockSpec(shape, idx, pipeline_mode=pl.Buffered(1))
    return pl.BlockSpec(shape, idx)


def _pick_block_b(B):
    """Batch tile: fill the 256-wide MXU; keep both v7x TCs busy for mid-size B."""
    b8 = _round_up(B, 8)
    if b8 <= 256:
        return b8
    if b8 <= 512:
        return _round_up((b8 + 1) // 2, 8)    # two balanced tiles
    return 256


# -----------------------------------------------------------------------------
# One-time parameter preparation (hoisted out of the per-call path).
# -----------------------------------------------------------------------------
def prepare_params(params, *, eps=1e-5, compute_dtype=jnp.bfloat16):
    """Fold eval-mode BatchNorm1d into the linears, zero-pad to MXU-friendly shapes
    and cast to bf16 ONCE.  Call this outside the serving loop and reuse the result."""
    d_in = params["w1"].shape[0]
    d_out = params["w5"].shape[1]              # 10
    d_in_pad = _round_up(d_in, 128)            # 156 -> 256: clean K tiles
    d_out_pad = max(256, _round_up(d_out, 128))  # 10 -> 256: fills MXU N, lane-dense store

    def fold_layer(k):
        w, b = params[f"w{k}"], params[f"b{k}"]
        gamma, beta = params[f"bn{k}_gamma"], params[f"bn{k}_beta"]
        mean, var = params[f"bn{k}_mean"], params[f"bn{k}_var"]
        scale = gamma * jax.lax.rsqrt(var + eps)
        w_f = (w * scale[None, :]).astype(compute_dtype)
        b_f = (b * scale + beta - mean * scale).astype(jnp.float32).reshape(1, -1)
        return w_f, b_f

    flat = []
    w1, b1 = fold_layer(1)
    w1 = jnp.pad(w1, ((0, d_in_pad - d_in), (0, 0)))   # zero rows <-> zero-padded x cols
    flat += [w1, b1]
    for k in (2, 3, 4):
        flat += list(fold_layer(k))
    w5 = jnp.pad(params["w5"], ((0, 0), (0, d_out_pad - d_out))).astype(compute_dtype)
    b5 = jnp.pad(params["b5"], (0, d_out_pad - d_out)).astype(jnp.float32).reshape(1, -1)
    flat += [w5, b5]
    flat = tuple(jax.block_until_ready(p) for p in flat)   # materialize once
    return flat, d_in, d_out


# -----------------------------------------------------------------------------
# Forward
# -----------------------------------------------------------------------------
@functools.partial(jax.jit, static_argnames=("block_b", "d_in", "d_out"))
def _forward_impl(emoca_features, flat_params, block_b, d_in, d_out):
    B = emoca_features.shape[0]
    d_in_pad = flat_params[0].shape[0]
    d_out_pad = flat_params[-2].shape[1]
    H = flat_params[0].shape[1]

    B_pad = _round_up(B, block_b)
    x = emoca_features.astype(jnp.bfloat16)
    x = jnp.pad(x, ((0, B_pad - B), (0, d_in_pad - d_in)))

    in_specs = [pl.BlockSpec((block_b, d_in_pad), lambda i: (i, 0))]
    in_specs += [_resident_spec(p.shape) for p in flat_params]

    # VMEM budget matching the real buffering: resident params (x2 if the
    # single-buffer path is unavailable), double-buffered I/O tiles, activation
    # scratch, plus headroom — capped at 90% of this generation's physical VMEM.
    buf_factor = 1 if _SINGLE_BUFFER_PARAMS else 2
    param_bytes = buf_factor * sum(math.prod(p.shape) * p.dtype.itemsize
                                   for p in flat_params)
    io_bytes = 2 * block_b * (d_in_pad * 2 + d_out_pad * 4)
    scratch_bytes = 2 * block_b * H * (4 + 2)          # f32 + bf16 intermediates
    needed = param_bytes + io_bytes + scratch_bytes + (8 << 20)
    vmem_limit = min(int(needed), int(_VMEM_CAP * 0.9))

    out_pad = pl.pallas_call(
        _mlp_kernel,
        out_shape=jax.ShapeDtypeStruct((B_pad, d_out_pad), jnp.float32),
        grid_spec=pltpu.PrefetchScalarGridSpec(
            num_scalar_prefetch=0,
            grid=(B_pad // block_b,),
            in_specs=in_specs,
            out_specs=pl.BlockSpec((block_b, d_out_pad), lambda i: (i, 0)),
        ),
        compiler_params=pltpu.CompilerParams(
            dimension_semantics=("parallel",),
            vmem_limit_bytes=vmem_limit),
    )(x, *flat_params)

    out = out_pad[:B, :d_out]                 # drop zero-padded rows/lanes
    expression = out[:, :8]
    arousal = out[:, 8]
    valence = out[:, 9]
    return valence, arousal, expression


def emoca_emo_forward(emoca_features, prepared, block_b=None):
    """emoca_features: (B, input_size) float32.
    prepared: output of prepare_params(params) (built once, reused every call).
    Returns (valence, arousal, expression): (B,), (B,), (B, 8)."""
    flat_params, d_in, d_out = prepared
    B = emoca_features.shape[0]
    if block_b is None:
        block_b = _pick_block_b(B)
    return _forward_impl(emoca_features, flat_params, block_b, d_in, d_out)


# -----------------------------------------------------------------------------
# Glue: replicate the emoca_feature dict -> feature tensor preprocessing.
# (One stack per key + one concat; done outside the kernel, like the torch code.)
# -----------------------------------------------------------------------------
def build_emoca_features(emoca_feature_dict):
    parts = []
    for key in emoca_feature_dict:                            # insertion order, like torch
        stacked = jnp.stack([jnp.asarray(f, jnp.float32)
                             for f in emoca_feature_dict[key]], axis=1)   # (B, n_key)
        parts.append(stacked)
    return jnp.concatenate(parts, axis=1).astype(jnp.float32)             # (B, input_size)


def init_params(key, input_size, hidden_size, output_size):
    ks = jax.random.split(key, 10)
    p = {}
    dims = [(input_size, hidden_size), (hidden_size, hidden_size),
            (hidden_size, hidden_size), (hidden_size, hidden_size)]
    for i, (din, dout) in enumerate(dims, start=1):
        p[f"w{i}"] = (jax.random.normal(ks[i - 1], (din, dout), jnp.float32)
                      * (1.0 / jnp.sqrt(din)))
        p[f"b{i}"] = jax.random.normal(ks[i + 3], (dout,), jnp.float32) * 0.01
        p[f"bn{i}_gamma"] = jnp.ones((dout,), jnp.float32)
        p[f"bn{i}_beta"] = jnp.zeros((dout,), jnp.float32)
        p[f"bn{i}_mean"] = jnp.zeros((dout,), jnp.float32)
        p[f"bn{i}_var"] = jnp.ones((dout,), jnp.float32)
    p["w5"] = (jax.random.normal(ks[8], (hidden_size, output_size), jnp.float32)
               * (1.0 / jnp.sqrt(hidden_size)))
    p["b5"] = jax.random.normal(ks[9], (output_size,), jnp.float32) * 0.01
    return p


def _reference_forward(x, params):
    """Pure-JAX f32 reference mirroring the PyTorch module (eval mode)."""
    eps = 1e-5
    h = x
    for k in (1, 2, 3, 4):
        y = h @ params[f"w{k}"] + params[f"b{k}"]
        s = params[f"bn{k}_gamma"] / jnp.sqrt(params[f"bn{k}_var"] + eps)
        y = (y - params[f"bn{k}_mean"]) * s + params[f"bn{k}_beta"]
        h = jnp.where(y > 0, y, 0.2 * y)
    out = h @ params["w5"] + params["b5"]
    return out[:, 9], out[:, 8], out[:, :8]


if __name__ == "__main__":
    key = jax.random.PRNGKey(0)

    B = 8
    input_size = 156          # expcode(50) + posecode(6) + shapecode(100), as in EMOCA
    hidden_size = 256         # small stand-in for 2048 (identical structure)
    output_size = 10

    # Build an emoca_feature dict of lists of per-sample (B,) feature vectors.
    k_feat, k_param = jax.random.split(key)
    n_per_key = {"expcode": 50, "posecode": 6, "shapecode": 100}
    feat_keys = jax.random.split(k_feat, sum(n_per_key.values()))
    emoca_feature = {}
    idx = 0
    for name, n in n_per_key.items():
        emoca_feature[name] = [jax.random.normal(feat_keys[idx + j], (B,), jnp.float32)
                               for j in range(n)]
        idx += n

    emoca_features = build_emoca_features(emoca_feature)      # (B, 156)
    assert emoca_features.shape == (B, input_size)

    params = init_params(k_param, input_size, hidden_size, output_size)

    # One-time BN-fold + pad + bf16 cast (hoisted out of the per-call path).
    prepared = prepare_params(params)

    valence, arousal, expression = emoca_emo_forward(emoca_features, prepared)
    (valence, arousal, expression) = jax.block_until_ready((valence, arousal, expression))

    assert expression.shape == (B, 8)
    assert arousal.shape == (B,) and valence.shape == (B,)
    assert bool(jnp.all(jnp.isfinite(expression)))
    assert bool(jnp.all(jnp.isfinite(arousal))) and bool(jnp.all(jnp.isfinite(valence)))

    # Correctness vs. pure-JAX f32 reference (loose tolerance: bf16 weights/activations).
    v_ref, a_ref, e_ref = _reference_forward(emoca_features, params)
    max_err = max(float(jnp.max(jnp.abs(expression - e_ref))),
                  float(jnp.max(jnp.abs(arousal - a_ref))),
                  float(jnp.max(jnp.abs(valence - v_ref))))
    assert max_err < 0.25, f"max abs error vs reference too large: {max_err}"

    print("KERNEL_OK")
</pallas_src>

<mosaic_0001>
module attributes {stable_mosaic.version = 11 : i64} {
  func.func @_mlp_kernel(%arg0: i32, %arg1: memref<8x256xbf16, #tpu.memory_space<vmem>>, %arg2: memref<256x256xbf16, #tpu.memory_space<vmem>>, %arg3: memref<1x256xf32, #tpu.memory_space<vmem>>, %arg4: memref<256x256xbf16, #tpu.memory_space<vmem>>, %arg5: memref<1x256xf32, #tpu.memory_space<vmem>>, %arg6: memref<256x256xbf16, #tpu.memory_space<vmem>>, %arg7: memref<1x256xf32, #tpu.memory_space<vmem>>, %arg8: memref<256x256xbf16, #tpu.memory_space<vmem>>, %arg9: memref<1x256xf32, #tpu.memory_space<vmem>>, %arg10: memref<256x256xbf16, #tpu.memory_space<vmem>>, %arg11: memref<1x256xf32, #tpu.memory_space<vmem>>, %arg12: memref<8x256xf32, #tpu.memory_space<vmem>>) attributes {dimension_semantics = [#tpu.dimension_semantics<parallel>], iteration_bounds = array<i64: 1>, scalar_prefetch = 0 : i64, scratch_operands = 0 : i64, tpu.core_type = #tpu.core_type<tc>, window_params = [{transform_indices = @transform_0, window_bounds = array<i64: 8, 256>}, {pipeline_mode = #tpu.pipeline_mode<synchronous>, transform_indices = @transform_1, window_bounds = array<i64: 256, 256>}, {pipeline_mode = #tpu.pipeline_mode<synchronous>, transform_indices = @transform_2, window_bounds = array<i64: 1, 256>}, {pipeline_mode = #tpu.pipeline_mode<synchronous>, transform_indices = @transform_3, window_bounds = array<i64: 256, 256>}, {pipeline_mode = #tpu.pipeline_mode<synchronous>, transform_indices = @transform_4, window_bounds = array<i64: 1, 256>}, {pipeline_mode = #tpu.pipeline_mode<synchronous>, transform_indices = @transform_5, window_bounds = array<i64: 256, 256>}, {pipeline_mode = #tpu.pipeline_mode<synchronous>, transform_indices = @transform_6, window_bounds = array<i64: 1, 256>}, {pipeline_mode = #tpu.pipeline_mode<synchronous>, transform_indices = @transform_7, window_bounds = array<i64: 256, 256>}, {pipeline_mode = #tpu.pipeline_mode<synchronous>, transform_indices = @transform_8, window_bounds = array<i64: 1, 256>}, {pipeline_mode = #tpu.pipeline_mode<synchronous>, transform_indices = @transform_9, window_bounds = array<i64: 256, 256>}, {pipeline_mode = #tpu.pipeline_mode<synchronous>, transform_indices = @transform_10, window_bounds = array<i64: 1, 256>}, {transform_indices = @transform_11, window_bounds = array<i64: 8, 256>}]} {
    %c0 = arith.constant 0 : index
    %c0_0 = arith.constant 0 : index
    %0 = vector.load %arg1[%c0, %c0_0] : memref<8x256xbf16, #tpu.memory_space<vmem>>, vector<8x256xbf16>
    %c0_1 = arith.constant 0 : index
    %c0_2 = arith.constant 0 : index
    %1 = vector.load %arg2[%c0_1, %c0_2] : memref<256x256xbf16, #tpu.memory_space<vmem>>, vector<256x256xbf16>
    %cst = arith.constant dense<0.000000e+00> : vector<8x256xf32>
    %2 = tpu.matmul %0, %1, %cst {dimension_numbers = #tpu.dot_dimension_numbers<[1], [0], [0], [1], [0, 0, 1, 1], [], []>} : vector<8x256xbf16>, vector<256x256xbf16>, vector<8x256xf32> -> vector<8x256xf32>
    %c0_3 = arith.constant 0 : index
    %c0_4 = arith.constant 0 : index
    %3 = vector.load %arg3[%c0_3, %c0_4] : memref<1x256xf32, #tpu.memory_space<vmem>>, vector<1x256xf32>
    %4 = vector.broadcast %3 : vector<1x256xf32> to vector<8x256xf32>
    %5 = arith.addf %2, %4 : vector<8x256xf32>
    %cst_5 = arith.constant 2.000000e-01 : f32
    %6 = vector.broadcast %cst_5 : f32 to vector<8x256xf32>
    %7 = arith.mulf %6, %5 : vector<8x256xf32>
    %8 = arith.maximumf %5, %7 : vector<8x256xf32>
    %9 = arith.truncf %8 : vector<8x256xf32> to vector<8x256xbf16>
    %c0_6 = arith.constant 0 : index
    %c0_7 = arith.constant 0 : index
    %10 = vector.load %arg4[%c0_6, %c0_7] : memref<256x256xbf16, #tpu.memory_space<vmem>>, vector<256x256xbf16>
    %cst_8 = arith.constant dense<0.000000e+00> : vector<8x256xf32>
    %11 = tpu.matmul %9, %10, %cst_8 {dimension_numbers = #tpu.dot_dimension_numbers<[1], [0], [0], [1], [0, 0, 1, 1], [], []>} : vector<8x256xbf16>, vector<256x256xbf16>, vector<8x256xf32> -> vector<8x256xf32>
    %c0_9 = arith.constant 0 : index
    %c0_10 = arith.constant 0 : index
    %12 = vector.load %arg5[%c0_9, %c0_10] : memref<1x256xf32, #tpu.memory_space<vmem>>, vector<1x256xf32>
    %13 = vector.broadcast %12 : vector<1x256xf32> to vector<8x256xf32>
    %14 = arith.addf %11, %13 : vector<8x256xf32>
    %cst_11 = arith.constant 2.000000e-01 : f32
    %15 = vector.broadcast %cst_11 : f32 to vector<8x256xf32>
    %16 = arith.mulf %15, %14 : vector<8x256xf32>
    %17 = arith.maximumf %14, %16 : vector<8x256xf32>
    %18 = arith.truncf %17 : vector<8x256xf32> to vector<8x256xbf16>
    %c0_12 = arith.constant 0 : index
    %c0_13 = arith.constant 0 : index
    %19 = vector.load %arg6[%c0_12, %c0_13] : memref<256x256xbf16, #tpu.memory_space<vmem>>, vector<256x256xbf16>
    %cst_14 = arith.constant dense<0.000000e+00> : vector<8x256xf32>
    %20 = tpu.matmul %18, %19, %cst_14 {dimension_numbers = #tpu.dot_dimension_numbers<[1], [0], [0], [1], [0, 0, 1, 1], [], []>} : vector<8x256xbf16>, vector<256x256xbf16>, vector<8x256xf32> -> vector<8x256xf32>
    %c0_15 = arith.constant 0 : index
    %c0_16 = arith.constant 0 : index
    %21 = vector.load %arg7[%c0_15, %c0_16] : memref<1x256xf32, #tpu.memory_space<vmem>>, vector<1x256xf32>
    %22 = vector.broadcast %21 : vector<1x256xf32> to vector<8x256xf32>
    %23 = arith.addf %20, %22 : vector<8x256xf32>
    %cst_17 = arith.constant 2.000000e-01 : f32
    %24 = vector.broadcast %cst_17 : f32 to vector<8x256xf32>
    %25 = arith.mulf %24, %23 : vector<8x256xf32>
    %26 = arith.maximumf %23, %25 : vector<8x256xf32>
    %27 = arith.truncf %26 : vector<8x256xf32> to vector<8x256xbf16>
    %c0_18 = arith.constant 0 : index
    %c0_19 = arith.constant 0 : index
    %28 = vector.load %arg8[%c0_18, %c0_19] : memref<256x256xbf16, #tpu.memory_space<vmem>>, vector<256x256xbf16>
    %cst_20 = arith.constant dense<0.000000e+00> : vector<8x256xf32>
    %29 = tpu.matmul %27, %28, %cst_20 {dimension_numbers = #tpu.dot_dimension_numbers<[1], [0], [0], [1], [0, 0, 1, 1], [], []>} : vector<8x256xbf16>, vector<256x256xbf16>, vector<8x256xf32> -> vector<8x256xf32>
    %c0_21 = arith.constant 0 : index
    %c0_22 = arith.constant 0 : index
    %30 = vector.load %arg9[%c0_21, %c0_22] : memref<1x256xf32, #tpu.memory_space<vmem>>, vector<1x256xf32>
    %31 = vector.broadcast %30 : vector<1x256xf32> to vector<8x256xf32>
    %32 = arith.addf %29, %31 : vector<8x256xf32>
    %cst_23 = arith.constant 2.000000e-01 : f32
    %33 = vector.broadcast %cst_23 : f32 to vector<8x256xf32>
    %34 = arith.mulf %33, %32 : vector<8x256xf32>
    %35 = arith.maximumf %32, %34 : vector<8x256xf32>
    %36 = arith.truncf %35 : vector<8x256xf32> to vector<8x256xbf16>
    %c0_24 = arith.constant 0 : index
    %c0_25 = arith.constant 0 : index
    %37 = vector.load %arg10[%c0_24, %c0_25] : memref<256x256xbf16, #tpu.memory_space<vmem>>, vector<256x256xbf16>
    %cst_26 = arith.constant dense<0.000000e+00> : vector<8x256xf32>
    %38 = tpu.matmul %36, %37, %cst_26 {dimension_numbers = #tpu.dot_dimension_numbers<[1], [0], [0], [1], [0, 0, 1, 1], [], []>} : vector<8x256xbf16>, vector<256x256xbf16>, vector<8x256xf32> -> vector<8x256xf32>
    %c0_27 = arith.constant 0 : index
    %c0_28 = arith.constant 0 : index
    %39 = vector.load %arg11[%c0_27, %c0_28] : memref<1x256xf32, #tpu.memory_space<vmem>>, vector<1x256xf32>
    %40 = vector.broadcast %39 : vector<1x256xf32> to vector<8x256xf32>
    %41 = arith.addf %38, %40 : vector<8x256xf32>
    %c0_29 = arith.constant 0 : index
    %c0_30 = arith.constant 0 : index
    %42 = vector.load %arg12[%c0_29, %c0_30] : memref<8x256xf32, #tpu.memory_space<vmem>>, vector<8x256xf32>
    tpu.vector_store %arg12[%c0_29, %c0_30], %41 {strides = array<i32>} : memref<8x256xf32, #tpu.memory_space<vmem>>, vector<8x256xf32>,
    return
  }
  func.func @transform_0(%arg0: i32) -> (i32, i32) {
    %c0_i32 = arith.constant 0 : i32
    %c0_i32_0 = arith.constant 0 : i32
    return %arg0, %c0_i32 : i32, i32
  }
  func.func @transform_1(%arg0: i32) -> (i32, i32) {
    %c0_i32 = arith.constant 0 : i32
    %c0_i32_0 = arith.constant 0 : i32
    %c0_i32_1 = arith.constant 0 : i32
    return %c0_i32, %c0_i32_0 : i32, i32
  }
  func.func @transform_2(%arg0: i32) -> (i32, i32) {
    %c0_i32 = arith.constant 0 : i32
    %c0_i32_0 = arith.constant 0 : i32
    %c0_i32_1 = arith.constant 0 : i32
    return %c0_i32, %c0_i32_0 : i32, i32
  }
  func.func @transform_3(%arg0: i32) -> (i32, i32) {
    %c0_i32 = arith.constant 0 : i32
    %c0_i32_0 = arith.constant 0 : i32
    %c0_i32_1 = arith.constant 0 : i32
    return %c0_i32, %c0_i32_0 : i32, i32
  }
  func.func @transform_4(%arg0: i32) -> (i32, i32) {
    %c0_i32 = arith.constant 0 : i32
    %c0_i32_0 = arith.constant 0 : i32
    %c0_i32_1 = arith.constant 0 : i32
    return %c0_i32, %c0_i32_0 : i32, i32
  }
  func.func @transform_5(%arg0: i32) -> (i32, i32) {
    %c0_i32 = arith.constant 0 : i32
    %c0_i32_0 = arith.constant 0 : i32
    %c0_i32_1 = arith.constant 0 : i32
    return %c0_i32, %c0_i32_0 : i32, i32
  }
  func.func @transform_6(%arg0: i32) -> (i32, i32) {
    %c0_i32 = arith.constant 0 : i32
    %c0_i32_0 = arith.constant 0 : i32
    %c0_i32_1 = arith.constant 0 : i32
    return %c0_i32, %c0_i32_0 : i32, i32
  }
  func.func @transform_7(%arg0: i32) -> (i32, i32) {
    %c0_i32 = arith.constant 0 : i32
    %c0_i32_0 = arith.constant 0 : i32
    %c0_i32_1 = arith.constant 0 : i32
    return %c0_i32, %c0_i32_0 : i32, i32
  }
  func.func @transform_8(%arg0: i32) -> (i32, i32) {
    %c0_i32 = arith.constant 0 : i32
    %c0_i32_0 = arith.constant 0 : i32
    %c0_i32_1 = arith.constant 0 : i32
    return %c0_i32, %c0_i32_0 : i32, i32
  }
  func.func @transform_9(%arg0: i32) -> (i32, i32) {
    %c0_i32 = arith.constant 0 : i32
    %c0_i32_0 = arith.constant 0 : i32
    %c0_i32_1 = arith.constant 0 : i32
    return %c0_i32, %c0_i32_0 : i32, i32
  }
  func.func @transform_10(%arg0: i32) -> (i32, i32) {
    %c0_i32 = arith.constant 0 : i32
    %c0_i32_0 = arith.constant 0 : i32
    %c0_i32_1 = arith.constant 0 : i32
    return %c0_i32, %c0_i32_0 : i32, i32
  }
  func.func @transform_11(%arg0: i32) -> (i32, i32) {
    %c0_i32 = arith.constant 0 : i32
    %c0_i32_0 = arith.constant 0 : i32
    return %arg0, %c0_i32 : i32, i32
  }
}

</mosaic_0001>

<bundles_post_ra>
// kernel: _forward_impl.1
= control target key start
LH: loop header
LB: loop body
LE: loop exit
PB: predicated region body
PF: predicated region fallthrough
CT: control target
= control target key end

     0   :  { %16 = vsyncpa [#allocation3], 0  ;;  %s2099_s0 = inlined_call_operand.vmem [shape: bf16[8,256], index: 0, kind: input, shape index: {}]   ;;  %s2100_s1 = inlined_call_operand.hbm [shape: bf16[256,256], index: 1, kind: input, shape index: {}]   ;;  %s2101_s2 = inlined_call_operand.vmem [shape: f32[1,256], index: 2, kind: input, shape index: {}]   ;;  %s2102_s3 = inlined_call_operand.hbm [shape: bf16[256,256], index: 3, kind: input, shape index: {}]   ;;  %s2103_s4 = inlined_call_operand.vmem [shape: f32[1,256], index: 4, kind: input, shape index: {}]   ;;  %s2104_s5 = inlined_call_operand.hbm [shape: bf16[256,256], index: 5, kind: input, shape index: {}]   ;;  %s2105_s6 = inlined_call_operand.vmem [shape: f32[1,256], index: 6, kind: input, shape index: {}]   ;;  %s2106_s7 = inlined_call_operand.hbm [shape: bf16[256,256], index: 7, kind: input, shape index: {}]   ;;  %s2107_s8 = inlined_call_operand.vmem [shape: f32[1,256], index: 8, kind: input, shape index: {}]   ;;  %s2108_s9 = inlined_call_operand.hbm [shape: bf16[256,256], index: 9, kind: input, shape index: {}]   ;;  %s2109_s10 = inlined_call_operand.vmem [shape: f32[1,256], index: 10, kind: input, shape index: {}]   ;;  %s2110_s11 = inlined_call_operand.vmem [shape: f32[8,256], index: 11, kind: output, shape index: {}]  }
   0x1   :  { %17 = vsyncpa [#allocation5], 0 }
   0x2   :  { %18 = vsyncpa [#allocation8], 0  ;;  %s1899_s17 = smov [#allocation4]   ;;  %s1900_s19 = smov [#allocation7]  }
   0x3   :  { %s40_s18 = sshll.u32 %s1899_s17, 4  ;;  %s68_s20 = sshll.u32 %s1900_s19, 4  ;;  %s41_s18 = int_to_ptr.vmem [resolvable:$true] %s40_s18  ;;  %s1966_s20 = int_to_ptr.vmem [resolvable:$true] %s68_s20 }
   0x4   :  { %s1783_s23 = scalar_lea.hbm %s2102_s3, 4096 }
   0x5   :  { %p1784_p0 = scmp.ne.s32.totalorder %s2102_s3, %s1783_s23  ;;  %p1787_p1 = scmp.lt.u32.totalorder %s1783_s23, %s2102_s3 }
   0x7   :  { %p1789_p2 = pnand %p1787_p1, %p1784_p0 }
   0x9   :  { %1792 = shalt.err (!%p1789_p2)
}
   0xa   :  { %s1793_s28 = scalar_lea.vmem %s41_s18, 4096  ;;  %p1798_p4 = scmp.lt.s32.totalorder %s41_s18, %s41_s18 }
   0xb   :  { %p1794_p3 = scmp.ne.s32.totalorder %s41_s18, %s1793_s28  ;;  %p1799_p5 = scmp.lt.s32.totalorder %s1793_s28, %s1793_s28 }
   0xd   :  { %p1800_p6 = por %p1799_p5, %p1798_p4 }
   0xf   :  { %p1801_p7 = pnand %p1800_p6, %p1794_p3 }
  0x11   :  { %1804 = shalt.err (!%p1801_p7)
}
  0x12   :  { %s1901_s29 = smov 128   ;;  %s1902_s30 = smov 8  }
  0x13   :  { %46 = dma.hbm_to_vmem [thread:$0]  %s2102_s3, 4096, %s41_s18, [#allocation5], %s1901_s29, %s1901_s29, %s1902_s30  }
  0x14   :  { %s1805_s16 = scalar_lea.hbm %s2106_s7, 4096 }
  0x15   :  { %p1806_p8 = scmp.ne.s32.totalorder %s2106_s7, %s1805_s16  ;;  %p1809_p9 = scmp.lt.u32.totalorder %s1805_s16, %s2106_s7 }
  0x17   :  { %p1811_p10 = pnand %p1809_p9, %p1806_p8 }
  0x19   :  { %1814 = shalt.err (!%p1811_p10)
}
  0x1a   :  { %s1815_s23 = scalar_lea.vmem %s1966_s20, 4096  ;;  %p1820_p12 = scmp.lt.s32.totalorder %s1966_s20, %s1966_s20 }
  0x1b   :  { %p1816_p11 = scmp.ne.s32.totalorder %s1966_s20, %s1815_s23  ;;  %p1821_p13 = scmp.lt.s32.totalorder %s1815_s23, %s1815_s23 }
  0x1d   :  { %p1822_p0 = por %p1821_p13, %p1820_p12 }
  0x1f   :  { %p1823_p1 = pnand %p1822_p0, %p1816_p11 }
  0x21   :  { %1826 = shalt.err (!%p1823_p1)
}
  0x22   :  { %74 = dma.hbm_to_vmem [thread:$0]  %s2106_s7, 4096, %s1966_s20, [#allocation8], %s1901_s29, %s1901_s29, %s1902_s30  }
  0x23   :  { %s1903_s24 = smov [#allocation2]   ;;  %s1904_s26 = smov [#allocation6]  }
  0x24   :  { %s26_s25 = sshll.u32 %s1903_s24, 4  ;;  %s54_s27 = sshll.u32 %s1904_s26, 4  ;;  %s27_s25 = int_to_ptr.vmem [resolvable:$true] %s26_s25  ;;  %s2003_s27 = int_to_ptr.vmem [resolvable:$true] %s54_s27 }
  0x25   :  { %s1827_s13 = scalar_lea.hbm %s2100_s1, 4096 }
  0x26   :  { %p1828_p2 = scmp.ne.s32.totalorder %s2100_s1, %s1827_s13  ;;  %p1831_p3 = scmp.lt.u32.totalorder %s1827_s13, %s2100_s1 }
  0x28   :  { %p1833_p4 = pnand %p1831_p3, %p1828_p2 }
  0x2a   :  { %1836 = shalt.err (!%p1833_p4)
}
  0x2b   :  { %s1837_s7 = scalar_lea.vmem %s27_s25, 4096  ;;  %p1842_p6 = scmp.lt.s32.totalorder %s27_s25, %s27_s25 }
  0x2c   :  { %p1838_p5 = scmp.ne.s32.totalorder %s27_s25, %s1837_s7  ;;  %p1843_p7 = scmp.lt.s32.totalorder %s1837_s7, %s1837_s7 }
  0x2e   :  { %p1844_p8 = por %p1843_p7, %p1842_p6 }
  0x30   :  { %p1845_p9 = pnand %p1844_p8, %p1838_p5 }
  0x32   :  { %1848 = shalt.err (!%p1845_p9)
}
  0x33   :  { %32 = dma.hbm_to_vmem [thread:$0]  %s2100_s1, 4096, %s27_s25, [#allocation3], %s1901_s29, %s1901_s29, %s1902_s30  }
  0x34   :  { %s1849_s23 = scalar_lea.hbm %s2104_s5, 4096 }
  0x35   :  { %p1850_p10 = scmp.ne.s32.totalorder %s2104_s5, %s1849_s23  ;;  %p1853_p11 = scmp.lt.u32.totalorder %s1849_s23, %s2104_s5 }
  0x37   :  { %p1855_p12 = pnand %p1853_p11, %p1850_p10 }
  0x39   :  { %1858 = shalt.err (!%p1855_p12)
}
  0x3a   :  { %s1859_s28 = scalar_lea.vmem %s2003_s27, 4096  ;;  %p1864_p0 = scmp.lt.s32.totalorder %s2003_s27, %s2003_s27 }
  0x3b   :  { %p1860_p13 = scmp.ne.s32.totalorder %s2003_s27, %s1859_s28  ;;  %p1865_p1 = scmp.lt.s32.totalorder %s1859_s28, %s1859_s28 }
  0x3d   :  { %p1866_p2 = por %p1865_p1, %p1864_p0 }
  0x3f   :  { %p1867_p3 = pnand %p1866_p2, %p1860_p13 }
  0x41   :  { %1870 = shalt.err (!%p1867_p3)
}
  0x42   :  { %60 = dma.hbm_to_vmem [thread:$0]  %s2104_s5, 4096, %s2003_s27, [#allocation5], %s1901_s29, %s1901_s29, %s1902_s30  }
  0x43   :  { %s1905_s12 = smov [#allocation9]   ;;  %s1871_s16 = scalar_lea.hbm %s2108_s9, 4096 }
  0x44   :  { %s82_s13 = sshll.u32 %s1905_s12, 4  ;;  %p1872_p4 = scmp.ne.s32.totalorder %s2108_s9, %s1871_s16  ;;  %s83_s13 = int_to_ptr.vmem [resolvable:$true] %s82_s13 }
  0x45   :  { %p1875_p5 = scmp.lt.u32.totalorder %s1871_s16, %s2108_s9 }
  0x47   :  { %p1877_p6 = pnand %p1875_p5, %p1872_p4 }
  0x49   :  { %1880 = shalt.err (!%p1877_p6)
}
  0x4a   :  { %s1881_s21 = scalar_lea.vmem %s83_s13, 4096  ;;  %p1886_p8 = scmp.lt.s32.totalorder %s83_s13, %s83_s13 }
  0x4b   :  { %p1882_p7 = scmp.ne.s32.totalorder %s83_s13, %s1881_s21  ;;  %p1887_p9 = scmp.lt.s32.totalorder %s1881_s21, %s1881_s21 }
  0x4d   :  { %p1888_p10 = por %p1887_p9, %p1886_p8 }
  0x4f   :  { %p1889_p11 = pnand %p1888_p10, %p1882_p7 }
  0x51   :  { %1892 = shalt.err (!%p1889_p11)
}
  0x52   :  { %88 = dma.hbm_to_vmem [thread:$0]  %s2108_s9, 4096, %s83_s13, [#allocation8], %s1901_s29, %s1901_s29, %s1902_s30  }
  0x53   :  { %1893 = dma.done.wait [#allocation3], 4096  }
  0x54   :  { %1894 = vsyncadd [#allocation3], 4294963200 }
  0x55   :  { %1895 = dma.done.wait [#allocation5], 8192  }
  0x56   :  { %1896 = vsyncadd [#allocation5], 4294959104 }
  0x57   :  { %1897 = dma.done.wait [#allocation8], 8192  }
  0x58   :  { %1898 = vsyncadd [#allocation8], 4294959104  ;;  %v1541_v0 = vld [vmem:[#allocation2 + $0x4] ss:$8 sps:$4 sm:$0xff]   ;;  %v1543_v1 = vld [vmem:[#allocation2] ss:$8 sps:$4 sm:$0xff]  }
  0x59   :  { %318 = vmatprep.subr.bf16.mxu0 %v1541_v0  ;;  %v1544_v2 = vld [vmem:[#allocation2 + $0x14] ss:$8 sps:$4 sm:$0xff]   ;;  %v1546_v3 = vld [vmem:[#allocation2 + $0x10] ss:$8 sps:$4 sm:$0xff]   ;;  %v1547_v4 = vld [vmem:[#allocation2 + $0x24] ss:$8 sps:$4 sm:$0xff]  }
  0x5a   :  { %319 = vmatpush1.bf16.msra.mxu0 %v1543_v1  ;;  %v1549_v5 = vld [vmem:[#allocation2 + $0x20] ss:$8 sps:$4 sm:$0xff]   ;;  %v1550_v6 = vld [vmem:[#allocation2 + $0x34] ss:$8 sps:$4 sm:$0xff]   ;;  %v1552_v7 = vld [vmem:[#allocation2 + $0x30] ss:$8 sps:$4 sm:$0xff]  }
  0x5b   :  { %320 = vmatprep.subr.bf16.mxu0 %v1544_v2  ;;  %v1553_v8 = vld [vmem:[#allocation2 + $0x44] ss:$8 sps:$4 sm:$0xff]   ;;  %v1555_v9 = vld [vmem:[#allocation2 + $0x40] ss:$8 sps:$4 sm:$0xff]   ;;  %v1556_v10 = vld [vmem:[#allocation2 + $0x54] ss:$8 sps:$4 sm:$0xff]  }
  0x5c   :  { %v1558_v11 = vld [vmem:[#allocation2 + $0x50] ss:$8 sps:$4 sm:$0xff]   ;;  %v1559_v12 = vld [vmem:[#allocation2 + $0x64] ss:$8 sps:$4 sm:$0xff]   ;;  %v1561_v13 = vld [vmem:[#allocation2 + $0x60] ss:$8 sps:$4 sm:$0xff]  }
  0x5d   :  { %v2058_v14 = vld [vmem:[%s2099_s0] sm:$0xff]  ;;  %v1594_v18 = vld [vmem:[#allocation4 + $0x14] ss:$8 sps:$4 sm:$0xff]   ;;  %v1564_v20 = vld [vmem:[#allocation2 + $0x70] ss:$8 sps:$4 sm:$0xff]  }
  0x5e   :  { %321 = vmatpush1.bf16.msra.mxu0 %v1546_v3  ;;  %v1373_v15 = vcombine.high %v2058_v14, %v2058_v14  ;;  %v1591_v16 = vld [vmem:[#allocation4 + $0x4] ss:$8 sps:$4 sm:$0xff]   ;;  %v1593_v17 = vld [vmem:[#allocation4] ss:$8 sps:$4 sm:$0xff]   ;;  %v1562_v19 = vld [vmem:[#allocation2 + $0x74] ss:$8 sps:$4 sm:$0xff]   ;;  %v1372_v57 = vcombine.low %v2058_v14, %v2058_v14 }
  0x5f   :  { %322 = vmatprep.subr.bf16.mxu0 %v1547_v4  ;;  %569 = vmatprep.subr.bf16.mxu1 %v1591_v16  ;;  %v1596_v21 = vld [vmem:[#allocation4 + $0x10] ss:$8 sps:$4 sm:$0xff]   ;;  %v1597_v22 = vld [vmem:[#allocation4 + $0x24] ss:$8 sps:$4 sm:$0xff]   ;;  %v1567_v24 = vld [vmem:[#allocation2 + $0x80] ss:$8 sps:$4 sm:$0xff]  }
  0x60   :  { %350 = vmatprep.mubr.bf16.mxu0 %v1373_v15  ;;  %570 = vmatpush1.bf16.msra.mxu1 %v1593_v17  ;;  %v1565_v23 = vld [vmem:[#allocation2 + $0x84] ss:$8 sps:$4 sm:$0xff]   ;;  %v1599_v25 = vld [vmem:[#allocation4 + $0x20] ss:$8 sps:$4 sm:$0xff]   ;;  %v1600_v26 = vld [vmem:[#allocation4 + $0x34] ss:$8 sps:$4 sm:$0xff]  }
  0x61   :  { %571 = vmatprep.subr.bf16.mxu1 %v1594_v18  ;;  %v1568_v27 = vld [vmem:[#allocation2 + $0x94] ss:$8 sps:$4 sm:$0xff]   ;;  %v1570_v28 = vld [vmem:[#allocation2 + $0x90] ss:$8 sps:$4 sm:$0xff]   ;;  %v1603_v30 = vld [vmem:[#allocation4 + $0x44] ss:$8 sps:$4 sm:$0xff]  }
  0x62   :  { %323 = vmatpush1.bf16.msra.mxu0 %v1549_v5  ;;  %v1602_v29 = vld [vmem:[#allocation4 + $0x30] ss:$8 sps:$4 sm:$0xff]   ;;  %v1571_v31 = vld [vmem:[#allocation2 + $0xa4] ss:$8 sps:$4 sm:$0xff]   ;;  %v1573_v32 = vld [vmem:[#allocation2 + $0xa0] ss:$8 sps:$4 sm:$0xff]  }
  0x63   :  { %324 = vmatprep.subr.bf16.mxu0 %v1550_v6  ;;  %v1574_v33 = vld [vmem:[#allocation2 + $0xb4] ss:$8 sps:$4 sm:$0xff]   ;;  %v1605_v34 = vld [vmem:[#allocation4 + $0x40] ss:$8 sps:$4 sm:$0xff]   ;;  %v1608_v36 = vld [vmem:[#allocation4 + $0x50] ss:$8 sps:$4 sm:$0xff]  }
  0x64   :  { %572 = vmatpush1.bf16.msra.mxu1 %v1596_v21  ;;  %v1606_v35 = vld [vmem:[#allocation4 + $0x54] ss:$8 sps:$4 sm:$0xff]   ;;  %v1576_v37 = vld [vmem:[#allocation2 + $0xb0] ss:$8 sps:$4 sm:$0xff]   ;;  %v1609_v38 = vld [vmem:[#allocation4 + $0x64] ss:$8 sps:$4 sm:$0xff]  }
  0x65   :  { %573 = vmatprep.subr.bf16.mxu1 %v1597_v22  ;;  %v1577_v39 = vld [vmem:[#allocation2 + $0xc4] ss:$8 sps:$4 sm:$0xff]   ;;  %v1611_v40 = vld [vmem:[#allocation4 + $0x60] ss:$8 sps:$4 sm:$0xff]   ;;  %v1612_v42 = vld [vmem:[#allocation4 + $0x74] ss:$8 sps:$4 sm:$0xff]  }
  0x66   :  { %325 = vmatpush1.bf16.msra.mxu0 %v1552_v7  ;;  %v1579_v41 = vld [vmem:[#allocation2 + $0xc0] ss:$8 sps:$4 sm:$0xff]   ;;  %v1580_v43 = vld [vmem:[#allocation2 + $0xd4] ss:$8 sps:$4 sm:$0xff]   ;;  %v1614_v44 = vld [vmem:[#allocation4 + $0x70] ss:$8 sps:$4 sm:$0xff]  }
  0x67   :  { %326 = vmatprep.subr.bf16.mxu0 %v1553_v8  ;;  %v1582_v45 = vld [vmem:[#allocation2 + $0xd0] ss:$8 sps:$4 sm:$0xff]   ;;  %v1615_v46 = vld [vmem:[#allocation4 + $0x84] ss:$8 sps:$4 sm:$0xff]   ;;  %v1617_v48 = vld [vmem:[#allocation4 + $0x80] ss:$8 sps:$4 sm:$0xff]  }
  0x68   :  { %574 = vmatpush1.bf16.msra.mxu1 %v1599_v25  ;;  %v1583_v47 = vld [vmem:[#allocation2 + $0xe4] ss:$8 sps:$4 sm:$0xff]   ;;  %v1585_v49 = vld [vmem:[#allocation2 + $0xe0] ss:$8 sps:$4 sm:$0xff]   ;;  %v1618_v50 = vld [vmem:[#allocation4 + $0x94] ss:$8 sps:$4 sm:$0xff]  }
  0x69   :  { %575 = vmatprep.subr.bf16.mxu1 %v1600_v26  ;;  %v1586_v51 = vld [vmem:[#allocation2 + $0xf4] ss:$8 sps:$4 sm:$0xff]   ;;  %v1620_v52 = vld [vmem:[#allocation4 + $0x90] ss:$8 sps:$4 sm:$0xff]   ;;  %v1621_v54 = vld [vmem:[#allocation4 + $0xa4] ss:$8 sps:$4 sm:$0xff]  }
  0x6a   :  { %327 = vmatpush1.bf16.msra.mxu0 %v1555_v9  ;;  %v1588_v53 = vld [vmem:[#allocation2 + $0xf0] ss:$8 sps:$4 sm:$0xff]   ;;  %v1623_v55 = vld [vmem:[#allocation4 + $0xa0] ss:$8 sps:$4 sm:$0xff]   ;;  %v1624_v56 = vld [vmem:[#allocation4 + $0xb4] ss:$8 sps:$4 sm:$0xff]  }
  0x6b   :  { %328 = vmatprep.subr.bf16.mxu0 %v1556_v10  ;;  %v1626_v58 = vld [vmem:[#allocation4 + $0xb0] ss:$8 sps:$4 sm:$0xff]   ;;  %v1627_v59 = vld [vmem:[#allocation4 + $0xc4] ss:$8 sps:$4 sm:$0xff]   ;;  %v1629_v60 = vld [vmem:[#allocation4 + $0xc0] ss:$8 sps:$4 sm:$0xff]  }
  0x6c   :  { %576 = vmatpush1.bf16.msra.mxu1 %v1602_v29  ;;  %v1630_v61 = vld [vmem:[#allocation4 + $0xd4] ss:$8 sps:$4 sm:$0xff]   ;;  %v1632_v62 = vld [vmem:[#allocation4 + $0xd0] ss:$8 sps:$4 sm:$0xff]   ;;  %v1633_v63 = vld [vmem:[#allocation4 + $0xe4] ss:$8 sps:$4 sm:$0xff]  }
  0x6d   :  { %577 = vmatprep.subr.bf16.mxu1 %v1603_v30  ;;  %v1635_v0 = vld [vmem:[#allocation4 + $0xe0] ss:$8 sps:$4 sm:$0xff]   ;;  %v1636_v1 = vld [vmem:[#allocation4 + $0xf4] ss:$8 sps:$4 sm:$0xff]   ;;  %v1638_v2 = vld [vmem:[#allocation4 + $0xf0] ss:$8 sps:$4 sm:$0xff]  }
  0x6e   :  { %329 = vmatpush1.bf16.msra.mxu0 %v1558_v11  ;;  %v1639_v3 = vld [vmem:[#allocation6] ss:$8 sps:$4 sm:$0xff]   ;;  %v1641_v4 = vld [vmem:[#allocation6 + $0x4] ss:$8 sps:$4 sm:$0xff]   ;;  %v1644_v5 = vld [vmem:[#allocation6 + $0x14] ss:$8 sps:$4 sm:$0xff]  }
  0x6f   :  { %330 = vmatprep.subr.bf16.mxu0 %v1559_v12  ;;  %v1642_v6 = vld [vmem:[#allocation6 + $0x10] ss:$8 sps:$4 sm:$0xff]   ;;  %v1647_v7 = vld [vmem:[#allocation6 + $0x24] ss:$8 sps:$4 sm:$0xff]   ;;  %v1645_v8 = vld [vmem:[#allocation6 + $0x20] ss:$8 sps:$4 sm:$0xff]  }
  0x70   :  { %578 = vmatpush1.bf16.msra.mxu1 %v1605_v34  ;;  %v1650_v9 = vld [vmem:[#allocation6 + $0x34] ss:$8 sps:$4 sm:$0xff]   ;;  %v1648_v10 = vld [vmem:[#allocation6 + $0x30] ss:$8 sps:$4 sm:$0xff]   ;;  %v1653_v11 = vld [vmem:[#allocation6 + $0x44] ss:$8 sps:$4 sm:$0xff]  }
  0x71   :  { %579 = vmatprep.subr.bf16.mxu1 %v1606_v35  ;;  %v1651_v12 = vld [vmem:[#allocation6 + $0x40] ss:$8 sps:$4 sm:$0xff]   ;;  %v1654_v14 = vld [vmem:[#allocation6 + $0x50] ss:$8 sps:$4 sm:$0xff]   ;;  %v1659_v15 = vld [vmem:[#allocation6 + $0x64] ss:$8 sps:$4 sm:$0xff]  }
  0x72   :  { %331 = vmatpush1.bf16.msra.mxu0 %v1561_v13  ;;  %v1656_v13 = vld [vmem:[#allocation6 + $0x54] ss:$8 sps:$4 sm:$0xff]   ;;  %v1657_v16 = vld [vmem:[#allocation6 + $0x60] ss:$8 sps:$4 sm:$0xff]   ;;  %v1660_v18 = vld [vmem:[#allocation6 + $0x70] ss:$8 sps:$4 sm:$0xff]  }
  0x73   :  { %332 = vmatprep.subr.bf16.mxu0 %v1562_v19  ;;  %v1662_v17 = vld [vmem:[#allocation6 + $0x74] ss:$8 sps:$4 sm:$0xff]   ;;  %v1665_v19 = vld [vmem:[#allocation6 + $0x84] ss:$8 sps:$4 sm:$0xff]   ;;  %v1666_v22 = vld [vmem:[#allocation6 + $0x90] ss:$8 sps:$4 sm:$0xff]  }
  0x74   :  { %580 = vmatpush1.bf16.msra.mxu1 %v1608_v36  ;;  %v1668_v21 = vld [vmem:[#allocation6 + $0x94] ss:$8 sps:$4 sm:$0xff]   ;;  %v1672_v26 = vld [vmem:[#allocation6 + $0xb0] ss:$8 sps:$4 sm:$0xff]   ;;  %v139_v34 = vld [vmem:[%s2101_s2] sm:$0x3] }
  0x75   :  { %581 = vmatprep.subr.bf16.mxu1 %v1609_v38  ;;  %v1674_v25 = vld [vmem:[#allocation6 + $0xb4] ss:$8 sps:$4 sm:$0xff]   ;;  %v1678_v30 = vld [vmem:[#allocation6 + $0xd0] ss:$8 sps:$4 sm:$0xff]  }
  0x76   :  { %333 = vmatpush1.bf16.msra.mxu0 %v1564_v20  ;;  %v1663_v20 = vld [vmem:[#allocation6 + $0x80] ss:$8 sps:$4 sm:$0xff]   ;;  %v1680_v29 = vld [vmem:[#allocation6 + $0xd4] ss:$8 sps:$4 sm:$0xff]  }
  0x77   :  { %334 = vmatprep.subr.bf16.mxu0 %v1565_v23  ;;  %v1671_v23 = vld [vmem:[#allocation6 + $0xa4] ss:$8 sps:$4 sm:$0xff]  }
  0x78   :  { %582 = vmatpush1.bf16.msra.mxu1 %v1611_v40 }
  0x79   :  { %583 = vmatprep.subr.bf16.mxu1 %v1612_v42 }
  0x7a   :  { %335 = vmatpush1.bf16.msra.mxu0 %v1567_v24  ;;  %v1669_v24 = vld [vmem:[#allocation6 + $0xa0] ss:$8 sps:$4 sm:$0xff]  }
  0x7b   :  { %336 = vmatprep.subr.bf16.mxu0 %v1568_v27  ;;  %v1677_v27 = vld [vmem:[#allocation6 + $0xc4] ss:$8 sps:$4 sm:$0xff]  }
  0x7c   :  { %584 = vmatpush1.bf16.msra.mxu1 %v1614_v44 }
  0x7d   :  { %585 = vmatprep.subr.bf16.mxu1 %v1615_v46 }
  0x7e   :  { %337 = vmatpush1.bf16.msra.mxu0 %v1570_v28  ;;  %v1675_v28 = vld [vmem:[#allocation6 + $0xc0] ss:$8 sps:$4 sm:$0xff]  }
  0x7f   :  { %338 = vmatprep.subr.bf16.mxu0 %v1571_v31  ;;  %v141_v31 = vlaneseq }
  0x80   :  { %586 = vmatpush1.bf16.msra.mxu1 %v1617_v48 }
  0x81   :  { %587 = vmatprep.subr.bf16.mxu1 %v1618_v50  ;;  %v1683_v50 = vld [vmem:[#allocation6 + $0xe4] ss:$8 sps:$4 sm:$0xff]  }
  0x82   :  { %339 = vmatpush1.bf16.msra.mxu0 %v1573_v32  ;;  %v142_v32 = vshrl.u32 %v141_v31, 7 }
  0x83   :  { %340 = vmatprep.subr.bf16.mxu0 %v1574_v33 }
  0x84   :  { %588 = vmatpush1.bf16.msra.mxu1 %v1620_v52  ;;  %v2064_v33 = vsub.s32 0, %v142_v32  ;;  %v2069_v35 = vsub.s32 1, %v142_v32  ;;  %v1686_v52 = vld [vmem:[#allocation6 + $0xf4] ss:$8 sps:$4 sm:$0xff]  }
  0x85   :  { %589 = vmatprep.subr.bf16.mxu1 %v1621_v54  ;;  %v1687_v54 = vld [vmem:[#allocation7] ss:$8 sps:$4 sm:$0xff]  }
  0x86   :  { %341 = vmatpush1.bf16.msra.mxu0 %v1576_v37  ;;  %v144_v36 = vrot.slane %v139_v34, %v2064_v33  ;;  %v148_v37 = vrot.slane %v139_v34, %v2069_v35  ;;  %v1731_v34 = vld [vmem:[#allocation7 + $0xe4] ss:$8 sps:$4 sm:$0xff]  }
  0x87   :  { %342 = vmatprep.subr.bf16.mxu0 %v1577_v39 }
  0x88   :  { %590 = vmatpush1.bf16.msra.mxu1 %v1623_v55  ;;  %v1689_v55 = vld [vmem:[#allocation7 + $0x4] ss:$8 sps:$4 sm:$0xff]  }
  0x89   :  { %591 = vmatprep.subr.bf16.mxu1 %v1624_v56  ;;  %v1692_v56 = vld [vmem:[#allocation7 + $0x14] ss:$8 sps:$4 sm:$0xff]  }
  0x8a   :  { %343 = vmatpush1.bf16.msra.mxu0 %v1579_v41 }
  0x8b   :  { %344 = vmatprep.subr.bf16.mxu0 %v1580_v43 }
  0x8c   :  { %592 = vmatpush1.bf16.msra.mxu1 %v1626_v58  ;;  %v1695_v58 = vld [vmem:[#allocation7 + $0x24] ss:$8 sps:$4 sm:$0xff]  }
  0x8d   :  { %593 = vmatprep.subr.bf16.mxu1 %v1627_v59  ;;  %v1693_v59 = vld [vmem:[#allocation7 + $0x20] ss:$8 sps:$4 sm:$0xff]  }
  0x8e   :  { %345 = vmatpush1.bf16.msra.mxu0 %v1582_v45 }
  0x8f   :  { %346 = vmatprep.subr.bf16.mxu0 %v1583_v47 }
  0x90   :  { %594 = vmatpush1.bf16.msra.mxu1 %v1629_v60  ;;  %v1698_v60 = vld [vmem:[#allocation7 + $0x34] ss:$8 sps:$4 sm:$0xff]  }
  0x91   :  { %595 = vmatprep.subr.bf16.mxu1 %v1630_v61  ;;  %v1696_v61 = vld [vmem:[#allocation7 + $0x30] ss:$8 sps:$4 sm:$0xff]  }
  0x92   :  { %347 = vmatpush1.bf16.msra.mxu0 %v1585_v49 }
  0x93   :  { %348 = vmatprep.subr.bf16.mxu0 %v1586_v51  ;;  %v1681_v51 = vld [vmem:[#allocation6 + $0xe0] ss:$8 sps:$4 sm:$0xff]  }
  0x94   :  { %596 = vmatpush1.bf16.msra.mxu1 %v1632_v62  ;;  %v1701_v62 = vld [vmem:[#allocation7 + $0x44] ss:$8 sps:$4 sm:$0xff]  }
  0x95   :  { %597 = vmatprep.subr.bf16.mxu1 %v1633_v63  ;;  %v1699_v63 = vld [vmem:[#allocation7 + $0x40] ss:$8 sps:$4 sm:$0xff]  }
  0x96   :  { %349 = vmatpush1.bf16.msra.mxu0 %v1588_v53  ;;  %v1684_v53 = vld [vmem:[#allocation6 + $0xf0] ss:$8 sps:$4 sm:$0xff]  }
  0x97   :  { %820 = vmatprep.subr.bf16.mxu0 %v1641_v4  ;;  %v1710_v4 = vld [vmem:[#allocation7 + $0x74] ss:$8 sps:$4 sm:$0xff]  }
  0x98   :  { %598 = vmatpush1.bf16.msra.mxu1 %v1635_v0  ;;  %v1704_v0 = vld [vmem:[#allocation7 + $0x54] ss:$8 sps:$4 sm:$0xff]  }
  0x99   :  { %351 = vmatmul.mubr.bf16.vlgmr.msra.gmra.mrb[0].mxu0 %v1372_v57  ;;  %599 = vmatprep.subr.bf16.mxu1 %v1636_v1  ;;  %v1690_v57 = vld [vmem:[#allocation7 + $0x10] ss:$8 sps:$4 sm:$0xff]  }
  0x9a   :  { %821 = vmatpush1.bf16.msra.mxu0 %v1639_v3  ;;  %v1702_v1 = vld [vmem:[#allocation7 + $0x50] ss:$8 sps:$4 sm:$0xff]   ;;  %v1705_v3 = vld [vmem:[#allocation7 + $0x60] ss:$8 sps:$4 sm:$0xff]  }
  0x9b   :  { %822 = vmatprep.subr.bf16.mxu0 %v1644_v5  ;;  %v1708_v5 = vld [vmem:[#allocation7 + $0x70] ss:$8 sps:$4 sm:$0xff]  }
  0x9c   :  { %600 = vmatpush1.bf16.msra.mxu1 %v1638_v2  ;;  %v1707_v2 = vld [vmem:[#allocation7 + $0x64] ss:$8 sps:$4 sm:$0xff]  }
  0x9d   :  { %1071 = vmatprep.subr.bf16.mxu1 %v1689_v55  ;;  %v1761_v55 = vld [vmem:[#allocation9 + $0x84] ss:$8 sps:$4 sm:$0xff]  }
  0x9e   :  { %823 = vmatpush1.bf16.msra.mxu0 %v1642_v6  ;;  %v1713_v6 = vld [vmem:[#allocation7 + $0x84] ss:$8 sps:$4 sm:$0xff]  }
  0x9f   :  { %824 = vmatprep.subr.bf16.mxu0 %v1647_v7  ;;  %v1711_v7 = vld [vmem:[#allocation7 + $0x80] ss:$8 sps:$4 sm:$0xff]  }
  0xa2   :  { %825 = vmatpush1.bf16.msra.mxu0 %v1645_v8  ;;  %v1716_v8 = vld [vmem:[#allocation7 + $0x94] ss:$8 sps:$4 sm:$0xff]  }
  0xa3   :  { %826 = vmatprep.subr.bf16.mxu0 %v1650_v9  ;;  %v1714_v9 = vld [vmem:[#allocation7 + $0x90] ss:$8 sps:$4 sm:$0xff]  }
  0xa6   :  { %827 = vmatpush1.bf16.msra.mxu0 %v1648_v10  ;;  %v1719_v10 = vld [vmem:[#allocation7 + $0xa4] ss:$8 sps:$4 sm:$0xff]  }
  0xa7   :  { %828 = vmatprep.subr.bf16.mxu0 %v1653_v11  ;;  %v1717_v11 = vld [vmem:[#allocation7 + $0xa0] ss:$8 sps:$4 sm:$0xff]  }
  0xaa   :  { %829 = vmatpush1.bf16.msra.mxu0 %v1651_v12  ;;  %v1722_v12 = vld [vmem:[#allocation7 + $0xb4] ss:$8 sps:$4 sm:$0xff]  }
  0xab   :  { %830 = vmatprep.subr.bf16.mxu0 %v1656_v13  ;;  %v1720_v13 = vld [vmem:[#allocation7 + $0xb0] ss:$8 sps:$4 sm:$0xff]  }
  0xae   :  { %831 = vmatpush1.bf16.msra.mxu0 %v1654_v14  ;;  %v1725_v14 = vld [vmem:[#allocation7 + $0xc4] ss:$8 sps:$4 sm:$0xff]  }
  0xaf   :  { %832 = vmatprep.subr.bf16.mxu0 %v1659_v15  ;;  %v1723_v15 = vld [vmem:[#allocation7 + $0xc0] ss:$8 sps:$4 sm:$0xff]  }
  0xb2   :  { %833 = vmatpush1.bf16.msra.mxu0 %v1657_v16  ;;  %v1728_v16 = vld [vmem:[#allocation7 + $0xd4] ss:$8 sps:$4 sm:$0xff]  }
  0xb3   :  { %834 = vmatprep.subr.bf16.mxu0 %v1662_v17  ;;  %v1726_v17 = vld [vmem:[#allocation7 + $0xd0] ss:$8 sps:$4 sm:$0xff]  }
  0xb6   :  { %835 = vmatpush1.bf16.msra.mxu0 %v1660_v18  ;;  %v397_v18 = vld [vmem:[%s2103_s4] sm:$0x3] }
  0xb7   :  { %836 = vmatprep.subr.bf16.mxu0 %v1665_v19  ;;  %v402_v19 = vrot.slane %v397_v18, %v2064_v33 }
  0xba   :  { %837 = vmatpush1.bf16.msra.mxu0 %v1663_v20  ;;  %v406_v20 = vrot.slane %v397_v18, %v2069_v35  ;;  %v1779_v18 = vld [vmem:[#allocation9 + $0xe4] ss:$8 sps:$4 sm:$0xff]  }
  0xbb   :  { %838 = vmatprep.subr.bf16.mxu0 %v1668_v21 }
  0xbe   :  { %839 = vmatpush1.bf16.msra.mxu0 %v1666_v22 }
  0xbf   :  { %840 = vmatprep.subr.bf16.mxu0 %v1671_v23 }
  0xc2   :  { %841 = vmatpush1.bf16.msra.mxu0 %v1669_v24 }
  0xc3   :  { %842 = vmatprep.subr.bf16.mxu0 %v1674_v25 }
  0xc6   :  { %843 = vmatpush1.bf16.msra.mxu0 %v1672_v26 }
  0xc7   :  { %844 = vmatprep.subr.bf16.mxu0 %v1677_v27 }
  0xca   :  { %845 = vmatpush1.bf16.msra.mxu0 %v1675_v28 }
  0xcb   :  { %846 = vmatprep.subr.bf16.mxu0 %v1680_v29 }
  0xce   :  { %847 = vmatpush1.bf16.msra.mxu0 %v1678_v30 }
  0xcf   :  { %848 = vmatprep.subr.bf16.mxu0 %v1683_v50  ;;  %v1750_v50 = vld [vmem:[#allocation9 + $0x50] ss:$8 sps:$4 sm:$0xff]  }
  0xd2   :  { %849 = vmatpush1.bf16.msra.mxu0 %v1681_v51  ;;  %v1755_v51 = vld [vmem:[#allocation9 + $0x64] ss:$8 sps:$4 sm:$0xff]  }
  0xd3   :  { %850 = vmatprep.subr.bf16.mxu0 %v1686_v52  ;;  %v1753_v52 = vld [vmem:[#allocation9 + $0x60] ss:$8 sps:$4 sm:$0xff]  }
  0xd6   :  { %851 = vmatpush1.bf16.msra.mxu0 %v1684_v53  ;;  %v1758_v53 = vld [vmem:[#allocation9 + $0x74] ss:$8 sps:$4 sm:$0xff]  }
 0x16c   :  { %v352_v38 = vpop.f32.mrb[0].mxu0 }
 0x16d   :  { %v353_v39 = vadd.f32 %v352_v38, %v144_v36  ;;  %v354_v40 = vpop.f32.mrb[1].mxu0  ;;  %v1729_v36 = vld [vmem:[#allocation7 + $0xe0] ss:$8 sps:$4 sm:$0xff]   ;;  %v1732_v38 = vld [vmem:[#allocation7 + $0xf0] ss:$8 sps:$4 sm:$0xff]  }
 0x16e   :  { %v355_v41 = vadd.f32 %v354_v40, %v148_v37  ;;  %v356_v42 = vpop.f32.mrb[2].mxu0  ;;  %v1734_v37 = vld [vmem:[#allocation7 + $0xf4] ss:$8 sps:$4 sm:$0xff]   ;;  %v1737_v40 = vld [vmem:[#allocation9 + $0x4] ss:$8 sps:$4 sm:$0xff]  }
 0x16f   :  { %v359_v43 = vmul.f32 0.2, %v353_v39  ;;  %v357_v44 = vpop.f32.mrb[3].mxu0  ;;  %1322 = vmatprep.subr.bf16.mxu0 %v1737_v40  ;;  %v1738_v42 = vld [vmem:[#allocation9 + $0x10] ss:$8 sps:$4 sm:$0xff]  }
 0x170   :  { %v360_v45 = vmul.f32 0.2, %v355_v41  ;;  %v1741_v44 = vld [vmem:[#allocation9 + $0x20] ss:$8 sps:$4 sm:$0xff]  }
 0x171   :  { %v361_v46 = vmax.f32 %v353_v39, %v359_v43  ;;  %v1735_v39 = vld [vmem:[#allocation9] ss:$8 sps:$4 sm:$0xff]   ;;  %v1743_v43 = vld [vmem:[#allocation9 + $0x24] ss:$8 sps:$4 sm:$0xff]  }
 0x172   :  { %v362_v47 = vmax.f32 %v355_v41, %v360_v45  ;;  %v1740_v41 = vld [vmem:[#allocation9 + $0x14] ss:$8 sps:$4 sm:$0xff]  }
 0x173   :  { %v363_v49 = vpack.c.bf16 %v361_v46, %v361_v46  ;;  %v1746_v45 = vld [vmem:[#allocation9 + $0x34] ss:$8 sps:$4 sm:$0xff]   ;;  %v1744_v46 = vld [vmem:[#allocation9 + $0x30] ss:$8 sps:$4 sm:$0xff]  }
 0x174   :  { %v364_v48 = vpack.c.bf16 %v362_v47, %v362_v47  ;;  %v1749_v47 = vld [vmem:[#allocation9 + $0x44] ss:$8 sps:$4 sm:$0xff]  }
 0x176   :  { %601 = vmatprep.mubr.bf16.mxu1 %v364_v48  ;;  %v1747_v48 = vld [vmem:[#allocation9 + $0x40] ss:$8 sps:$4 sm:$0xff]  }
 0x177   :  { %602 = vmatmul.mubr.bf16.vlgmr.msra.gmra.mrb[0].mxu1 %v363_v49  ;;  %v1752_v49 = vld [vmem:[#allocation9 + $0x54] ss:$8 sps:$4 sm:$0xff]  }
 0x178   :  { %1072 = vmatpush1.bf16.msra.mxu1 %v1687_v54  ;;  %v1756_v54 = vld [vmem:[#allocation9 + $0x70] ss:$8 sps:$4 sm:$0xff]  }
 0x179   :  { %1073 = vmatprep.subr.bf16.mxu1 %v1692_v56  ;;  %v1759_v56 = vld [vmem:[#allocation9 + $0x80] ss:$8 sps:$4 sm:$0xff]  }
 0x17c   :  { %1074 = vmatpush1.bf16.msra.mxu1 %v1690_v57  ;;  %v1764_v57 = vld [vmem:[#allocation9 + $0x94] ss:$8 sps:$4 sm:$0xff]  }
 0x17d   :  { %1075 = vmatprep.subr.bf16.mxu1 %v1695_v58  ;;  %v1762_v58 = vld [vmem:[#allocation9 + $0x90] ss:$8 sps:$4 sm:$0xff]  }
 0x180   :  { %1076 = vmatpush1.bf16.msra.mxu1 %v1693_v59  ;;  %v1767_v59 = vld [vmem:[#allocation9 + $0xa4] ss:$8 sps:$4 sm:$0xff]  }
 0x181   :  { %1077 = vmatprep.subr.bf16.mxu1 %v1698_v60  ;;  %v1765_v60 = vld [vmem:[#allocation9 + $0xa0] ss:$8 sps:$4 sm:$0xff]  }
 0x184   :  { %1078 = vmatpush1.bf16.msra.mxu1 %v1696_v61  ;;  %v1770_v61 = vld [vmem:[#allocation9 + $0xb4] ss:$8 sps:$4 sm:$0xff]  }
 0x185   :  { %1079 = vmatprep.subr.bf16.mxu1 %v1701_v62  ;;  %v1768_v62 = vld [vmem:[#allocation9 + $0xb0] ss:$8 sps:$4 sm:$0xff]  }
 0x188   :  { %1080 = vmatpush1.bf16.msra.mxu1 %v1699_v63  ;;  %v1773_v63 = vld [vmem:[#allocation9 + $0xc4] ss:$8 sps:$4 sm:$0xff]  }
 0x189   :  { %1081 = vmatprep.subr.bf16.mxu1 %v1704_v0  ;;  %v1771_v0 = vld [vmem:[#allocation9 + $0xc0] ss:$8 sps:$4 sm:$0xff]  }
 0x18c   :  { %1082 = vmatpush1.bf16.msra.mxu1 %v1702_v1  ;;  %v1776_v1 = vld [vmem:[#allocation9 + $0xd4] ss:$8 sps:$4 sm:$0xff]  }
 0x18d   :  { %1083 = vmatprep.subr.bf16.mxu1 %v1707_v2  ;;  %v1774_v2 = vld [vmem:[#allocation9 + $0xd0] ss:$8 sps:$4 sm:$0xff]  }
 0x190   :  { %1084 = vmatpush1.bf16.msra.mxu1 %v1705_v3  ;;  %v648_v3 = vld [vmem:[%s2105_s6] sm:$0x3] }
 0x191   :  { %1085 = vmatprep.subr.bf16.mxu1 %v1710_v4  ;;  %v653_v4 = vrot.slane %v648_v3, %v2064_v33 }
 0x194   :  { %1086 = vmatpush1.bf16.msra.mxu1 %v1708_v5  ;;  %v657_v5 = vrot.slane %v648_v3, %v2069_v35 }
 0x195   :  { %1087 = vmatprep.subr.bf16.mxu1 %v1713_v6 }
 0x198   :  { %1088 = vmatpush1.bf16.msra.mxu1 %v1711_v7 }
 0x199   :  { %1089 = vmatprep.subr.bf16.mxu1 %v1716_v8 }
 0x19c   :  { %1090 = vmatpush1.bf16.msra.mxu1 %v1714_v9 }
 0x19d   :  { %1091 = vmatprep.subr.bf16.mxu1 %v1719_v10 }
 0x1a0   :  { %1092 = vmatpush1.bf16.msra.mxu1 %v1717_v11 }
 0x1a1   :  { %1093 = vmatprep.subr.bf16.mxu1 %v1722_v12 }
 0x1a4   :  { %1094 = vmatpush1.bf16.msra.mxu1 %v1720_v13 }
 0x1a5   :  { %1095 = vmatprep.subr.bf16.mxu1 %v1725_v14 }
 0x1a8   :  { %1096 = vmatpush1.bf16.msra.mxu1 %v1723_v15 }
 0x1a9   :  { %1097 = vmatprep.subr.bf16.mxu1 %v1728_v16 }
 0x1ac   :  { %1098 = vmatpush1.bf16.msra.mxu1 %v1726_v17 }
 0x1ad   :  { %1099 = vmatprep.subr.bf16.mxu1 %v1731_v34 }
 0x1b0   :  { %1100 = vmatpush1.bf16.msra.mxu1 %v1729_v36 }
 0x1b1   :  { %1101 = vmatprep.subr.bf16.mxu1 %v1734_v37 }
 0x1b4   :  { %1102 = vmatpush1.bf16.msra.mxu1 %v1732_v38 }
 0x24a   :  { %v603_v21 = vpop.f32.mrb[0].mxu1 }
 0x24b   :  { %v604_v22 = vadd.f32 %v603_v21, %v402_v19  ;;  %v605_v23 = vpop.f32.mrb[1].mxu1  ;;  %v1777_v19 = vld [vmem:[#allocation9 + $0xe0] ss:$8 sps:$4 sm:$0xff]   ;;  %v1780_v21 = vld [vmem:[#allocation9 + $0xf0] ss:$8 sps:$4 sm:$0xff]  }
 0x24c   :  { %v606_v24 = vadd.f32 %v605_v23, %v406_v20  ;;  %v607_v25 = vpop.f32.mrb[2].mxu1  ;;  %v1782_v20 = vld [vmem:[#allocation9 + $0xf4] ss:$8 sps:$4 sm:$0xff]  }
 0x24d   :  { %v610_v26 = vmul.f32 0.2, %v604_v22  ;;  %v608_v27 = vpop.f32.mrb[3].mxu1 }
 0x24e   :  { %v611_v28 = vmul.f32 0.2, %v606_v24 }
 0x24f   :  { %v612_v29 = vmax.f32 %v604_v22, %v610_v26  ;;  %v899_v22 = vld [vmem:[%s2107_s8] sm:$0x3] }
 0x250   :  { %v613_v30 = vmax.f32 %v606_v24, %v611_v28  ;;  %v904_v23 = vrot.slane %v899_v22, %v2064_v33  ;;  %v908_v24 = vrot.slane %v899_v22, %v2069_v35 }
 0x251   :  { %v614_v32 = vpack.c.bf16 %v612_v29, %v612_v29 }
 0x252   :  { %v615_v31 = vpack.c.bf16 %v613_v30, %v613_v30 }
 0x254   :  { %852 = vmatprep.mubr.bf16.mxu0 %v615_v31 }
 0x255   :  { %853 = vmatmul.mubr.bf16.vlgmr.msra.gmra.mrb[4].mxu0 %v614_v32 }
 0x256   :  { %1323 = vmatpush1.bf16.msra.mxu0 %v1735_v39  ;;  %v1150_v39 = vld [vmem:[%s2109_s10] sm:$0x3] }
 0x257   :  { %1324 = vmatprep.subr.bf16.mxu0 %v1740_v41  ;;  %v1155_v40 = vrot.slane %v1150_v39, %v2064_v33  ;;  %v1159_v41 = vrot.slane %v1150_v39, %v2069_v35 }
 0x25a   :  { %1325 = vmatpush1.bf16.msra.mxu0 %v1738_v42 }
 0x25b   :  { %1326 = vmatprep.subr.bf16.mxu0 %v1743_v43 }
 0x25e   :  { %1327 = vmatpush1.bf16.msra.mxu0 %v1741_v44 }
 0x25f   :  { %1328 = vmatprep.subr.bf16.mxu0 %v1746_v45 }
 0x262   :  { %1329 = vmatpush1.bf16.msra.mxu0 %v1744_v46 }
 0x263   :  { %1330 = vmatprep.subr.bf16.mxu0 %v1749_v47 }
 0x266   :  { %1331 = vmatpush1.bf16.msra.mxu0 %v1747_v48 }
 0x267   :  { %1332 = vmatprep.subr.bf16.mxu0 %v1752_v49 }
 0x26a   :  { %1333 = vmatpush1.bf16.msra.mxu0 %v1750_v50 }
 0x26b   :  { %1334 = vmatprep.subr.bf16.mxu0 %v1755_v51 }
 0x26e   :  { %1335 = vmatpush1.bf16.msra.mxu0 %v1753_v52 }
 0x26f   :  { %1336 = vmatprep.subr.bf16.mxu0 %v1758_v53 }
 0x272   :  { %1337 = vmatpush1.bf16.msra.mxu0 %v1756_v54 }
 0x273   :  { %1338 = vmatprep.subr.bf16.mxu0 %v1761_v55 }
 0x276   :  { %1339 = vmatpush1.bf16.msra.mxu0 %v1759_v56 }
 0x277   :  { %1340 = vmatprep.subr.bf16.mxu0 %v1764_v57 }
 0x27a   :  { %1341 = vmatpush1.bf16.msra.mxu0 %v1762_v58 }
 0x27b   :  { %1342 = vmatprep.subr.bf16.mxu0 %v1767_v59 }
 0x27e   :  { %1343 = vmatpush1.bf16.msra.mxu0 %v1765_v60 }
 0x27f   :  { %1344 = vmatprep.subr.bf16.mxu0 %v1770_v61 }
 0x282   :  { %1345 = vmatpush1.bf16.msra.mxu0 %v1768_v62 }
 0x283   :  { %1346 = vmatprep.subr.bf16.mxu0 %v1773_v63 }
 0x286   :  { %1347 = vmatpush1.bf16.msra.mxu0 %v1771_v0 }
 0x287   :  { %1348 = vmatprep.subr.bf16.mxu0 %v1776_v1 }
 0x28a   :  { %1349 = vmatpush1.bf16.msra.mxu0 %v1774_v2 }
 0x28b   :  { %1350 = vmatprep.subr.bf16.mxu0 %v1779_v18 }
 0x28e   :  { %1351 = vmatpush1.bf16.msra.mxu0 %v1777_v19 }
 0x28f   :  { %1352 = vmatprep.subr.bf16.mxu0 %v1782_v20 }
 0x292   :  { %1353 = vmatpush1.bf16.msra.mxu0 %v1780_v21 }
 0x328   :  { %v854_v6 = vpop.f32.mrb[4].mxu0 }
 0x329   :  { %v855_v7 = vadd.f32 %v854_v6, %v653_v4  ;;  %v856_v8 = vpop.f32.mrb[5].mxu0 }
 0x32a   :  { %v857_v9 = vadd.f32 %v856_v8, %v657_v5  ;;  %v858_v10 = vpop.f32.mrb[6].mxu0 }
 0x32b   :  { %v861_v11 = vmul.f32 0.2, %v855_v7  ;;  %v859_v12 = vpop.f32.mrb[7].mxu0 }
 0x32c   :  { %v862_v13 = vmul.f32 0.2, %v857_v9 }
 0x32d   :  { %v863_v14 = vmax.f32 %v855_v7, %v861_v11 }
 0x32e   :  { %v864_v15 = vmax.f32 %v857_v9, %v862_v13 }
 0x32f   :  { %v865_v17 = vpack.c.bf16 %v863_v14, %v863_v14 }
 0x330   :  { %v866_v16 = vpack.c.bf16 %v864_v15, %v864_v15 }
 0x332   :  { %1103 = vmatprep.mubr.bf16.mxu1 %v866_v16 }
 0x333   :  { %1104 = vmatmul.mubr.bf16.vlgmr.msra.gmra.mrb[4].mxu1 %v865_v17 }
 0x406   :  { %v1105_v25 = vpop.f32.mrb[4].mxu1 }
 0x407   :  { %v1106_v26 = vadd.f32 %v1105_v25, %v904_v23  ;;  %v1107_v27 = vpop.f32.mrb[5].mxu1 }
 0x408   :  { %v1108_v28 = vadd.f32 %v1107_v27, %v908_v24  ;;  %v1109_v29 = vpop.f32.mrb[6].mxu1 }
 0x409   :  { %v1112_v30 = vmul.f32 0.2, %v1106_v26  ;;  %v1110_v31 = vpop.f32.mrb[7].mxu1 }
 0x40a   :  { %v1113_v32 = vmul.f32 0.2, %v1108_v28 }
 0x40b   :  { %v1114_v34 = vmax.f32 %v1106_v26, %v1112_v30 }
 0x40c   :  { %v1115_v36 = vmax.f32 %v1108_v28, %v1113_v32 }
 0x40d   :  { %v1116_v38 = vpack.c.bf16 %v1114_v34, %v1114_v34 }
 0x40e   :  { %v1117_v37 = vpack.c.bf16 %v1115_v36, %v1115_v36 }
 0x410   :  { %1354 = vmatprep.mubr.bf16.mxu0 %v1117_v37 }
 0x411   :  { %1355 = vmatmul.mubr.bf16.vlgmr.msra.gmra.mrb[8].mxu0 %v1116_v38 }
 0x4e4   :  { %v1356_v42 = vpop.f32.mrb[8].mxu0 }
 0x4e5   :  { %v1357_v43 = vadd.f32 %v1356_v42, %v1155_v40  ;;  %v1358_v44 = vpop.f32.mrb[9].mxu0 }
 0x4e6   :  { %v1359_v45 = vadd.f32 %v1358_v44, %v1159_v41  ;;  %v1360_v46 = vpop.f32.mrb[10].mxu0 }
 0x4e7   :  { %1363 = vst [vmem:[%s2110_s11] sm:$0xff] %v1357_v43  ;;  %v1361_v47 = vpop.f32.mrb[11].mxu0 }
 0x4e8   :  { %1364 = vst [vmem:[%s2110_s11 + $0x8] sm:$0xff] %v1359_v45 }
 0x4e9   :  { %1369 = vsyncpa [#allocation3], 1 }
 0x4ea   :  { %1370 = vsyncpa [#allocation5], 1 }
 0x4eb   :  { %1371 = vsyncpa [#allocation8], 1 }

</bundles_post_ra>
